<compile_context>
chip_gen: v7x
topology: tpu7x:2x2x1
jax: 0.10.0
libtpu: 0.0.40
codegen_flags: <defaults>
</compile_context>

<pallas_src>
import jax
import jax.numpy as jnp
from jax import lax
from jax.experimental import pallas as pl
from jax.experimental.pallas import tpu as pltpu


def _im2col(xt, L, K, pad):
    """xt: (C, L) -> (K*C, L); row block k holds x[:, l + k - pad] (zero outside)."""
    c = xt.shape[0]
    if pad:
        z = jnp.zeros((c, pad), xt.dtype)
        xp = jnp.concatenate([z, xt, z], axis=1)          # (C, L + 2*pad)
    else:
        xp = xt
    return jnp.concatenate([xp[:, k:k + L] for k in range(K)], axis=0)


def double_conv(x, params, *, kernel_size=3, residual=False, eps=1e-5):
    """Pallas TPU forward of DoubleConv.  x: (N, Cin, L) f32 -> (N, Cout, L) f32."""
    N, Cin, L = x.shape
    K = kernel_size
    pad = K // 2
    w1 = params["w1"]                                      # (Cout, Cin, K)
    w2 = params["w2"]                                      # (Cout, Cout, K)
    Cout = w1.shape[0]
    res_needs_conv = residual and (Cin != Cout)
    f32, bf16 = jnp.float32, jnp.bfloat16

    x = x.astype(f32)
    # Weights pre-arranged for the im2col matmul: (Cout, K*C) with the same
    # (tap-major, channel-minor) row order that _im2col produces; cast once to bf16.
    w1c = jnp.transpose(w1, (0, 2, 1)).reshape(Cout, K * Cin).astype(bf16)
    w2c = jnp.transpose(w2, (0, 2, 1)).reshape(Cout, K * Cout).astype(bf16)
    gamma = params["gamma1"].astype(f32)
    beta = params["beta1"].astype(f32)

    cparams = pltpu.CompilerParams(
        dimension_semantics=("parallel",),                 # batch tiles are independent
        vmem_limit_bytes=32 * 1024 * 1024,
    )

    def batch_spec(c, l):       # one (c, l) slab per batch element, lane axis = L
        return pl.BlockSpec((None, c, l), lambda n: (n, 0, 0))

    def resident_spec(r, c):    # small weights / BN params, kept resident in VMEM
        return pl.BlockSpec((r, c), lambda n: (0, 0))

    def partial_stats(h):       # one-pass stats: per-tile sum and sum-of-squares
        return jnp.concatenate(
            [jnp.sum(h, axis=1, keepdims=True),
             jnp.sum(h * h, axis=1, keepdims=True)], axis=1)          # (Cout, 2)

    # ---- pass A: conv1 + partial stats --------------------------------------
    def pass_a(x_ref, w_ref, h_ref, st_ref):
        xcol = _im2col(x_ref[...], L, K, pad).astype(bf16)            # (K*Cin, L)
        h = jnp.dot(w_ref[...], xcol, preferred_element_type=f32)     # (Cout, L)
        h_ref[...] = h
        st_ref[...] = partial_stats(h)

    h1, st1 = pl.pallas_call(
        pass_a,
        grid=(N,),
        in_specs=[batch_spec(Cin, L), resident_spec(Cout, K * Cin)],
        out_specs=(batch_spec(Cout, L), batch_spec(Cout, 2)),
        out_shape=(jax.ShapeDtypeStruct((N, Cout, L), f32),
                   jax.ShapeDtypeStruct((N, Cout, 2), f32)),
        compiler_params=cparams,
    )(x, w1c)

    def bn_affine(st):
        """Fold global biased batch stats (training-mode BN) into scale/shift."""
        tot = jnp.sum(st, axis=0)                                     # (Cout, 2)
        cnt = float(N * L)
        mean = tot[:, 0] / cnt
        var = jnp.maximum(tot[:, 1] / cnt - mean * mean, 0.0)
        scl = gamma * lax.rsqrt(var + eps)
        return scl.reshape(Cout, 1), (beta - mean * scl).reshape(Cout, 1)

    sc1, sh1 = bn_affine(st1)

    # ---- pass B: bn1 + relu + conv2 + partial stats --------------------------
    def pass_b(h_ref, sc_ref, sh_ref, w_ref, h2_ref, st_ref):
        a = jnp.maximum(h_ref[...] * sc_ref[...] + sh_ref[...], 0.0)  # f32 epilogue
        acol = _im2col(a, L, K, pad).astype(bf16)                     # (K*Cout, L)
        h2 = jnp.dot(w_ref[...], acol, preferred_element_type=f32)    # (Cout, L)
        h2_ref[...] = h2
        st_ref[...] = partial_stats(h2)

    h2, st2 = pl.pallas_call(
        pass_b,
        grid=(N,),
        in_specs=[batch_spec(Cout, L), resident_spec(Cout, 1), resident_spec(Cout, 1),
                  resident_spec(Cout, K * Cout)],
        out_specs=(batch_spec(Cout, L), batch_spec(Cout, 2)),
        out_shape=(jax.ShapeDtypeStruct((N, Cout, L), f32),
                   jax.ShapeDtypeStruct((N, Cout, 2), f32)),
        compiler_params=cparams,
    )(h1, sc1, sh1, w2c)

    sc2, sh2 = bn_affine(st2)

    # ---- pass C: bn1 + residual + relu, lane-dense (N, Cout, L) output -------
    # Kernel signature is built conditionally so unused residual weights are never
    # allocated, DMA'd, or double-buffered.
    if res_needs_conv:
        rw = params["res_w"][:, :, 0].astype(bf16)                    # (Cout, Cin)
        rb = params["res_b"].reshape(Cout, 1).astype(f32)

        def pass_c(h_ref, sc_ref, sh_ref, x_ref, rw_ref, rb_ref, o_ref):
            y = h_ref[...] * sc_ref[...] + sh_ref[...]
            res = jnp.dot(rw_ref[...], x_ref[...].astype(bf16),
                          preferred_element_type=f32) + rb_ref[...]
            o_ref[...] = jnp.maximum(y + res, 0.0)

        in_specs = [batch_spec(Cout, L), resident_spec(Cout, 1), resident_spec(Cout, 1),
                    batch_spec(Cin, L), resident_spec(Cout, Cin), resident_spec(Cout, 1)]
        args = (h2, sc2, sh2, x, rw, rb)
    elif residual:  # identity residual (Cin == Cout)
        def pass_c(h_ref, sc_ref, sh_ref, x_ref, o_ref):
            y = h_ref[...] * sc_ref[...] + sh_ref[...] + x_ref[...]
            o_ref[...] = jnp.maximum(y, 0.0)

        in_specs = [batch_spec(Cout, L), resident_spec(Cout, 1), resident_spec(Cout, 1),
                    batch_spec(Cin, L)]
        args = (h2, sc2, sh2, x)
    else:
        def pass_c(h_ref, sc_ref, sh_ref, o_ref):
            o_ref[...] = jnp.maximum(h_ref[...] * sc_ref[...] + sh_ref[...], 0.0)

        in_specs = [batch_spec(Cout, L), resident_spec(Cout, 1), resident_spec(Cout, 1)]
        args = (h2, sc2, sh2)

    out = pl.pallas_call(
        pass_c,
        grid=(N,),
        in_specs=in_specs,
        out_specs=batch_spec(Cout, L),
        out_shape=jax.ShapeDtypeStruct((N, Cout, L), f32),
        compiler_params=cparams,
    )(*args)
    return out                                             # already PyTorch (N, Cout, L)


def double_conv_ref(x, params, *, kernel_size=3, residual=False, eps=1e-5):
    """Pure-JAX f32 reference matching the PyTorch forward (training-mode BN)."""
    Cin = x.shape[1]
    Cout = params["w1"].shape[0]
    dn = ("NCH", "OIH", "NCH")
    hp = lax.Precision.HIGHEST

    def conv(z, w, b=None):
        p = w.shape[2] // 2
        y = lax.conv_general_dilated(z, w, (1,), [(p, p)],
                                     dimension_numbers=dn, precision=hp)
        if b is not None:
            y = y + b.reshape(1, -1, 1)
        return y

    def bn1(y):
        m = y.mean(axis=(0, 2), keepdims=True)
        v = ((y - m) ** 2).mean(axis=(0, 2), keepdims=True)
        g = params["gamma1"].reshape(1, -1, 1)
        b = params["beta1"].reshape(1, -1, 1)
        return (y - m) / jnp.sqrt(v + eps) * g + b

    x_s = x
    if residual and Cin != Cout:
        x_s = conv(x, params["res_w"], params["res_b"])
    h = jax.nn.relu(bn1(conv(x, params["w1"])))
    y = bn1(conv(h, params["w2"]))
    if residual:
        y = y + x_s
    return jax.nn.relu(y)


def _make_params(key, cin, cout, ksz, with_res_conv):
    k1, k2, k3, k4, k5, k6 = jax.random.split(key, 6)
    p = {
        "w1": jax.random.normal(k1, (cout, cin, ksz), jnp.float32) * 0.2,
        "w2": jax.random.normal(k2, (cout, cout, ksz), jnp.float32) * 0.2,
        "gamma1": 1.0 + 0.1 * jax.random.normal(k3, (cout,), jnp.float32),
        "beta1": 0.1 * jax.random.normal(k4, (cout,), jnp.float32),
    }
    if with_res_conv:
        p["res_w"] = jax.random.normal(k5, (cout, cin, 1), jnp.float32) * 0.2
        p["res_b"] = jax.random.normal(k6, (cout,), jnp.float32) * 0.1
    return p


if __name__ == "__main__":
    key = jax.random.PRNGKey(0)
    N, L, K = 2, 16, 3
    cases = [
        dict(cin=4, cout=8, residual=True),    # residual via 1x1 res_conv (Cin != Cout)
        dict(cin=4, cout=8, residual=False),   # plain double conv
        dict(cin=8, cout=8, residual=True),    # identity residual (Cin == Cout)
    ]
    for i, case in enumerate(cases):
        kp, kx, key = jax.random.split(key, 3)
        cin, cout, residual = case["cin"], case["cout"], case["residual"]
        params = _make_params(kp, cin, cout, K, residual and cin != cout)
        x = jax.random.normal(kx, (N, cin, L), jnp.float32)

        out = jax.block_until_ready(
            double_conv(x, params, kernel_size=K, residual=residual))
        ref = jax.block_until_ready(
            double_conv_ref(x, params, kernel_size=K, residual=residual))

        assert out.shape == (N, cout, L), (i, out.shape)
        err = float(jnp.max(jnp.abs(out - ref)))
        # Kernel matmuls use bf16 operands (f32 accumulation); the reference is full
        # f32 HIGHEST, so allow bf16-level mismatch.  Real bugs produce O(0.5+) errors.
        assert err < 5e-2, f"case {i}: max abs err {err}"
    print("KERNEL_OK")
</pallas_src>

<mosaic_0001>
module attributes {stable_mosaic.version = 11 : i64} {
  func.func @pass_a(%arg0: i32, %arg1: memref<1x4x16xf32, #tpu.memory_space<vmem>>, %arg2: memref<8x12xbf16, #tpu.memory_space<vmem>>, %arg3: memref<1x8x16xf32, #tpu.memory_space<vmem>>, %arg4: memref<1x8x2xf32, #tpu.memory_space<vmem>>) attributes {dimension_semantics = [#tpu.dimension_semantics<parallel>], iteration_bounds = array<i64: 2>, scalar_prefetch = 0 : i64, scratch_operands = 0 : i64, tpu.core_type = #tpu.core_type<tc>, window_params = [{transform_indices = @transform_0, window_bounds = array<i64: 1, 4, 16>}, {pipeline_mode = #tpu.pipeline_mode<synchronous>, transform_indices = @transform_1, window_bounds = array<i64: 8, 12>}, {transform_indices = @transform_2, window_bounds = array<i64: 1, 8, 16>}, {transform_indices = @transform_3, window_bounds = array<i64: 1, 8, 2>}]} {
    %c0 = arith.constant 0 : index
    %c0_0 = arith.constant 0 : index
    %c0_1 = arith.constant 0 : index
    %0 = vector.load %arg1[%c0, %c0_0, %c0_1] : memref<1x4x16xf32, #tpu.memory_space<vmem>>, vector<1x4x16xf32>
    %1 = vector.shape_cast %0 : vector<1x4x16xf32> to vector<4x16xf32>
    %cst = arith.constant 0.000000e+00 : f32
    %2 = vector.broadcast %cst : f32 to vector<4x1xf32>
    %3 = tpu.concatenate %2, %1, %2 in 1 : vector<4x1xf32>, vector<4x16xf32>, vector<4x1xf32> -> vector<4x18xf32>
    %4 = vector.extract_strided_slice %3 {offsets = [0, 0], sizes = [4, 16], strides = [1, 1]} : vector<4x18xf32> to vector<4x16xf32>
    %5 = vector.extract_strided_slice %3 {offsets = [0, 1], sizes = [4, 16], strides = [1, 1]} : vector<4x18xf32> to vector<4x16xf32>
    %6 = vector.extract_strided_slice %3 {offsets = [0, 2], sizes = [4, 16], strides = [1, 1]} : vector<4x18xf32> to vector<4x16xf32>
    %7 = tpu.concatenate %4, %5, %6 in 0 : vector<4x16xf32>, vector<4x16xf32>, vector<4x16xf32> -> vector<12x16xf32>
    %8 = arith.truncf %7 : vector<12x16xf32> to vector<12x16xbf16>
    %c0_2 = arith.constant 0 : index
    %c0_3 = arith.constant 0 : index
    %9 = vector.load %arg2[%c0_2, %c0_3] : memref<8x12xbf16, #tpu.memory_space<vmem>>, vector<8x12xbf16>
    %cst_4 = arith.constant dense<0.000000e+00> : vector<8x16xf32>
    %10 = tpu.matmul %9, %8, %cst_4 {dimension_numbers = #tpu.dot_dimension_numbers<[1], [0], [0], [1], [0, 0, 1, 1], [], []>} : vector<8x12xbf16>, vector<12x16xbf16>, vector<8x16xf32> -> vector<8x16xf32>
    %c0_5 = arith.constant 0 : index
    %c0_6 = arith.constant 0 : index
    %c0_7 = arith.constant 0 : index
    %11 = vector.load %arg3[%c0_5, %c0_6, %c0_7] : memref<1x8x16xf32, #tpu.memory_space<vmem>>, vector<1x8x16xf32>
    %12 = vector.shape_cast %11 : vector<1x8x16xf32> to vector<8x16xf32>
    %13 = vector.shape_cast %10 : vector<8x16xf32> to vector<1x8x16xf32>
    tpu.vector_store %arg3[%c0_5, %c0_6, %c0_7], %13 {strides = array<i32>} : memref<1x8x16xf32, #tpu.memory_space<vmem>>, vector<1x8x16xf32>,
    %cst_8 = arith.constant dense<0.000000e+00> : vector<8xf32>
    %14 = vector.multi_reduction <add>, %10, %cst_8 [1] : vector<8x16xf32> to vector<8xf32>
    %15 = vector.shape_cast %14 : vector<8xf32> to vector<8x1xf32>
    %16 = arith.mulf %10, %10 : vector<8x16xf32>
    %cst_9 = arith.constant dense<0.000000e+00> : vector<8xf32>
    %17 = vector.multi_reduction <add>, %16, %cst_9 [1] : vector<8x16xf32> to vector<8xf32>
    %18 = vector.shape_cast %17 : vector<8xf32> to vector<8x1xf32>
    %19 = tpu.concatenate %15, %18 in 1 : vector<8x1xf32>, vector<8x1xf32> -> vector<8x2xf32>
    %c0_10 = arith.constant 0 : index
    %c0_11 = arith.constant 0 : index
    %c0_12 = arith.constant 0 : index
    %20 = vector.load %arg4[%c0_10, %c0_11, %c0_12] : memref<1x8x2xf32, #tpu.memory_space<vmem>>, vector<1x8x2xf32>
    %21 = vector.shape_cast %20 : vector<1x8x2xf32> to vector<8x2xf32>
    %22 = vector.shape_cast %19 : vector<8x2xf32> to vector<1x8x2xf32>
    tpu.vector_store %arg4[%c0_10, %c0_11, %c0_12], %22 {strides = array<i32>} : memref<1x8x2xf32, #tpu.memory_space<vmem>>, vector<1x8x2xf32>,
    return
  }
  func.func @transform_0(%arg0: i32) -> (i32, i32, i32) {
    %c0_i32 = arith.constant 0 : i32
    %c0_i32_0 = arith.constant 0 : i32
    %c0_i32_1 = arith.constant 0 : i32
    return %arg0, %c0_i32, %c0_i32_0 : i32, i32, i32
  }
  func.func @transform_1(%arg0: i32) -> (i32, i32) {
    %c0_i32 = arith.constant 0 : i32
    %c0_i32_0 = arith.constant 0 : i32
    %c0_i32_1 = arith.constant 0 : i32
    return %c0_i32, %c0_i32_0 : i32, i32
  }
  func.func @transform_2(%arg0: i32) -> (i32, i32, i32) {
    %c0_i32 = arith.constant 0 : i32
    %c0_i32_0 = arith.constant 0 : i32
    %c0_i32_1 = arith.constant 0 : i32
    return %arg0, %c0_i32, %c0_i32_0 : i32, i32, i32
  }
  func.func @transform_3(%arg0: i32) -> (i32, i32, i32) {
    %c0_i32 = arith.constant 0 : i32
    %c0_i32_0 = arith.constant 0 : i32
    %c0_i32_1 = arith.constant 0 : i32
    return %arg0, %c0_i32, %c0_i32_0 : i32, i32, i32
  }
}

</mosaic_0001>

<bundles_post_ra>
// kernel: tpu_custom_call.1
= control target key start
LH: loop header
LB: loop body
LE: loop exit
PB: predicated region body
PF: predicated region fallthrough
CT: control target
= control target key end

     0   :  { %9 = vsyncpa [#allocation3], 0  ;;  %s864_s0 = inlined_call_operand.hbm [shape: f32[2,4,16], index: 0, kind: input, shape index: {}]   ;;  %s865_s1 = inlined_call_operand.hbm [shape: bf16[8,12], index: 1, kind: input, shape index: {}]   ;;  %s866_s2 = inlined_call_operand.hbm [shape: f32[2,8,16], index: 2, kind: output, shape index: {0}]   ;;  %s867_s3 = inlined_call_operand.vmem [shape: f32[2,8,2], index: 3, kind: output, shape index: {1}]  }
   0x1   :  { %11 = vsyncpa [#allocation3 + $0x1], 0 }
   0x2   :  { %12 = vsyncpa [#allocation6], 0 }
   0x3   :  { %13 = vsyncpa [#allocation4], 0 }
   0x4   :  { %15 = vsyncpa [#allocation4 + $0x1], 0  ;;  %s661_s12 = smov 0   ;;  %s663_s13 = smov 0  }
   0x5   :  { %s665_s14 = smov 0   ;;  %s667_s15 = smov 0  }
   0x6 LB: > { %s682_s16 = sadd.s32 4294967295, %s631_s15   ;;  %s417_s17 = sadd.s32 4294967294, %s631_s15   ;;  %s631_s15 = sphi %s667_s15, %s891_s15   ;;  %s627_s14 = sphi %s665_s14, %s890_s14   ;;  %s623_s13 = sphi %s663_s13, %s889_s13   ;;  %s619_s12 = sphi %s661_s12, %s888_s12  }
   0x7   : > { %p41_p0 = scmp.ne.s32.totalorder %s623_s13, %s619_s12  ;;  %p868_p1 = scmp.eq.s32.totalorder %s682_s16, 0 }
   0x8   : > { %p92_p3 = scmp.eq.s32.totalorder %s417_s17, 1  ;;  %p418_p5 = scmp.ge.s32.totalorder %s631_s15, 1 }
   0x9   : > { %p691_p4 = por %p868_p1, %p41_p0  ;;  %p125_p7 = scmp.lt.s32.totalorder %s631_s15, 3 }
   0xa   : > { %p696_p6 = por %p92_p3, %p41_p0  ;;  %s633_s21 = smov [#allocation5]  }
   0xb   : > { %s871_s18 = scalar_select %p691_p4, 1, 0 }
   0xc   : > { %s872_s19 = scalar_select %p696_p6, 1, 0 }
   0xd   : > { %p701_p8 = pnand %p418_p5, %p125_p7  ;;  %s138_s22 = sshll.u32 %s633_s21, 4  ;;  %s139_s22 = int_to_ptr.vmem [resolvable:$true] %s138_s22 }
   0xe   : > { %s709_s23 = sadd.s32 1, %s631_s15   ;;  %s28_s27 = sadd.s32 1, %s627_s14 }
   0xf   : > { %s873_s20 = scalar_select %p701_p8, 1, 0 }
  0x10   : > { %p449_p10 = pneg %p701_p8  ;;  %s25_s25 = ssub.s32 %s631_s15, %s709_s23 }
  0x11   : > { %p719_p12 = scmp.eq.s32.totalorder %s25_s25, 0  ;;  %s503_s30 = scalar_lea.hbm %s865_s1, 64 }
  0x12   : > { %p713_p11 = pnand %p449_p10, %p868_p1  ;;  %p504_p0 = scmp.ne.s32.totalorder %s865_s1, %s503_s30 }
  0x13   : > { %s875_s26 = scalar_select %p719_p12, 1, 0 }
  0x14   : > { %p505_p3 = pneg %p713_p11  ;;  %p510_p10 = scmp.lt.u32.totalorder %s503_s30, %s865_s1 }
  0x16   : > { %p506_p5 = pnand %p505_p3, %p504_p0 }
  0x18   : > { %p507_p7 = pneg %p506_p5 }
  0x1a   : > { %p512_p9 = pnand %p510_p10, %p507_p7 }
  0x1c   : > { %515 = shalt.err (!%p512_p9)
}
  0x1d   : > { %s516_s8 = scalar_lea.vmem %s139_s22, 64  ;;  %p524_p6 = scmp.lt.s32.totalorder %s139_s22, %s139_s22 }
  0x1e   : > { %p517_p1 = scmp.ne.s32.totalorder %s139_s22, %s516_s8  ;;  %p525_p4 = scmp.lt.s32.totalorder %s516_s8, %s516_s8 }
  0x20   : > { %p519_p2 = pnand %p517_p1, %p505_p3  ;;  %p526_p8 = por %p525_p4, %p524_p6 }
  0x22   : > { %p520_p13 = pneg %p519_p2 }
  0x24   : > { %p527_p12 = pnand %p526_p8, %p520_p13 }
  0x26   : > { %530 = shalt.err (!%p527_p12)
}
  0x27   : > { %452 = dma.hbm_to_vmem [thread:$0]  (!%p713_p11), %s865_s1, 64, %s139_s22, [#allocation6]  }
  0x28   : > { %p876_p1 = scmp.ne.s32.totalorder %s875_s26, 0  ;;  %p36_p2 = scmp.eq.s32.totalorder %s631_s15, 0 }
  0x29   : > { %p877_p4 = scmp.ne.s32.totalorder %s627_s14, %s623_s13  ;;  %p878_p6 = scmp.eq.s32.totalorder %s682_s16, 1 }
  0x2a   : > { %s745_s11 = scalar_select %p876_p1, %s627_s14, %s28_s27  }
  0x2b   : > { %p753_p8 = por %p878_p6, %p877_p4  ;;  %p462_p9 = scmp.lt.s32.totalorder %s631_s15, 2 }
  0x2c   : > { %s149_s21 = sand.u32 1, %s627_s14   ;;  %p880_p12 = pmov %p877_p4 }
  0x2d   : > { %s421_s24 = sshll.u32 %s149_s21, 2  ;;  %s422_s25 = sshll.u32 %s631_s15, 6 }
  0x2e   : > { %p37_p13 = por %p36_p2, %p880_p12  ;;  %s766_s22 = scalar_lea.hbm %s864_s0, %s422_s25 }
  0x2f   : > { %s153_s26 = scalar_lea.vmem [#allocation2], %s421_s24  ;;  %s150_s4 = scalar_lea.sflag [#allocation3], %s149_s21 }
  0x30   : > { %s160_s27 = sshll.u32 %s153_s26, 4  ;;  %p768_p11 = pnand %p462_p9, %p37_p13  ;;  %s772_s27 = int_to_ptr.vmem [resolvable:$true] %s160_s27 }
  0x31   : > { %s531_s5 = scalar_lea.hbm %s766_s22, 64  ;;  %s536_s8 = scalar_lea.hbm %s864_s0, 128 }
  0x32   : > { %p532_p0 = scmp.ne.s32.totalorder %s766_s22, %s531_s5  ;;  %p533_p3 = pneg %p768_p11 }
  0x33   : > { %p537_p10 = scmp.lt.u32.totalorder %s766_s22, %s864_s0  ;;  %p538_p1 = scmp.lt.u32.totalorder %s536_s8, %s531_s5 }
  0x34   : > { %p534_p5 = pnand %p533_p3, %p532_p0  ;;  %p540_p4 = scmp.lt.u32.totalorder %s531_s5, %s766_s22 }
  0x35   : > { %p539_p2 = por %p538_p1, %p537_p10 }
  0x36   : > { %p535_p7 = pneg %p534_p5 }
  0x37   : > { %p541_p6 = por %p540_p4, %p539_p2 }
  0x39   : > { %p542_p9 = pnand %p541_p6, %p535_p7 }
  0x3b   : > { %545 = shalt.err (!%p542_p9)
}
  0x3c   : > { %s546_s21 = scalar_lea.vmem %s772_s27, 64  ;;  %s634_s24 = smov [#allocation2]  }
  0x3d   : > { %p547_p12 = scmp.ne.s32.totalorder %s772_s27, %s546_s21  ;;  %s551_s25 = sshll.u32 %s634_s24, 4  ;;  %s552_s25 = int_to_ptr.vmem [resolvable:$false] %s551_s25 }
  0x3e   : > { %s553_s28 = scalar_lea.vmem %s552_s25, 128  ;;  %p554_p5 = scmp.lt.s32.totalorder %s772_s27, %s552_s25 }
  0x3f   : > { %p549_p13 = pnand %p547_p12, %p533_p3  ;;  %p555_p10 = scmp.lt.s32.totalorder %s553_s28, %s546_s21 }
  0x41   : > { %p550_p0 = pneg %p549_p13  ;;  %p556_p1 = por %p555_p10, %p554_p5 }
  0x43   : > { %p557_p2 = pnand %p556_p1, %p550_p0 }
  0x45   : > { %560 = shalt.err (!%p557_p2)
}
  0x46   : > { %456 = dma.hbm_to_vmem [thread:$0]  (!%p768_p11), %s766_s22, 64, %s772_s27, %s150_s4  }
  0x47   : > { %p882_p7 = scmp.ne.s32.totalorder %s873_s20, 0 }
  0x48   : > { %s802_s29 = sand.u32 (!%p882_p7), 1, %s623_s13   ;;  %p883_p3 = scmp.ne.s32.totalorder (!%p882_p7), %s871_s18, 0 }
  0x49   : > { %169 = sbr.rel (%p882_p7) target bundleno = 685 (0x2ad), region = 28  ;;  %s424_s26 = sshll.u32 (!%p882_p7), %s802_s29, 2 }
  0x4a   : > { %s172_s5 = scalar_lea.sflag (!%p882_p7), [#allocation3], %s802_s29  ;;  %s175_s6 = scalar_lea.vmem (!%p882_p7), [#allocation2], %s424_s26 }
  0x50   : > { %606 = dma.done.wait (%p883_p3), %s172_s5, 64  }
  0x51   : > { %608 = vsyncadd (%p883_p3), %s172_s5, 4294967232  ;;  %p884_p4 = scmp.eq.s32.totalorder %s682_s16, 0 }
  0x53   : > { %610 = dma.done.wait (%p884_p4), [#allocation6], 64   ;;  %p885_p11 = pmov %p884_p4 }
  0x54   : > { %v211_v0 = vld [vmem:[%s175_s6] sm:$0xf]  ;;  %s635_s20 = smov 1   ;;  %v636_v1 = vmov 0.0   ;;  %vm637_vm0 = vmmov 0   ;;  %vm216_vm1 = vcmask 7168  }
  0x55   : > { %612 = vsyncadd (%p885_p11), [#allocation6], 4294967232  ;;  %213 = vrot.lane.b32.xlu0 %v211_v0, %s635_s20  ;;  %435 = vmatprep.subr.bf16.mxu0 %v636_v1  ;;  %vm218_vm2 = vcmask 138240   ;;  %s638_s18 = smov 126   ;;  %s639_s22 = smov 127   ;;  %vm228_vm3 = vcmask 1043456  }
  0x56   : > { %437 = vmatprep.mubr.msk.bf16.mxu0 %vm637_vm0, %v636_v1  ;;  %vm236_vm4 = vcmask 1045504   ;;  %v231_v11 = vld [vmem:[#allocation5] sm:$0xf]  ;;  %vm232_vm5 = vcmask 97280   ;;  %s426_s27 = sshll.u32 %s802_s29, 3  ;;  %vm280_vm6 = vcmask 130048  }
  0x57   : > { %s199_s30 = scalar_lea.vmem [#allocation7], %s426_s27  ;;  %s430_s4 = sshll.u32 %s682_s16, 7 }
  0x58   : > { %s820_s9 = scalar_lea.hbm %s866_s2, %s430_s4  ;;  %s310_s10 = sshll.u32 %s199_s30, 4  ;;  %s311_s10 = int_to_ptr.vmem [resolvable:$true] %s310_s10 }
  0x59   : > { %s293_s21 = scalar_lea.sflag [#allocation4], %s802_s29  ;;  %s561_s24 = scalar_lea.vmem %s311_s10, 128 }
  0x5a   : > { %p562_p6 = scmp.ne.s32.totalorder %s311_s10, %s561_s24  ;;  %s640_s25 = smov [#allocation7]  }
  0x5b   : > { %s565_s28 = sshll.u32 %s640_s25, 4  ;;  %s566_s28 = int_to_ptr.vmem [resolvable:$false] %s565_s28 }
  0x5c   : > { %p563_p9 = pnand %p562_p6, %p753_p8  ;;  %s567_s26 = scalar_lea.vmem %s566_s28, 256 }
  0x5d   : > { %p568_p13 = scmp.lt.s32.totalorder %s311_s10, %s566_s28  ;;  %p569_p0 = scmp.lt.s32.totalorder %s567_s26, %s561_s24 }
  0x5e   : > { %p564_p12 = pneg %p563_p9 }
  0x5f   : > { %p570_p5 = por %p569_p0, %p568_p13 }
  0x61   : > { %p571_p10 = pnand %p570_p5, %p564_p12 }
  0xc7   : > { %v214_v2 = vpop.permute.xlu0 %213 }
  0xc8   : > { %v217_v3 = vsel %vm216_vm1, 0.0, %v214_v2 }
  0xc9   : > { %v219_v4 = vsel %vm218_vm2, %v217_v3, 0.0 }
  0xca   : > { %v221_v5 = vrot.slane %v219_v4, 4  ;;  %225 = vrot.lane.b32.xlu1 %v219_v4, %s638_s18 }
  0xcc   : > { %222 = vrot.lane.b32.xlu0 %v221_v5, %s639_s22 }
 0x13c   : > { %v226_v7 = vpop.permute.xlu1 %225 }
 0x13e   : > { %v223_v6 = vpop.permute.xlu0 %222 }
 0x13f   : > { %v229_v8 = vsel %vm228_vm3, %v219_v4, %v223_v6 }
 0x140   : > { %v230_v9 = vpack.c.bf16 %v226_v7, %v229_v8 }
 0x142   : > { %v238_v10 = vsel %vm236_vm4, %v230_v9, 0 }
 0x143   : > { %436 = vmatpush3.bf16.msra.mxu0 %v238_v10 }
 0x146   : > { %438 = vmatmul.mubr.msk.bf16.vlgmr.msra.gmra.mrb[0].mxu0 %vm232_vm5, %v231_v11 }
 0x219   : > { %v274_v12 = vpop.f32.mrb[0].mxu0 }
 0x21a   : > { %v439_v13 = vpop.f32.mrb[1].mxu0  ;;  %v282_v14 = vsel %vm280_vm6, %v274_v12, 0.0  ;;  %v285_v15 = vmul.f32 %v274_v12, %v274_v12  ;;  %281 = vst.msk [vmem:[%s199_s30] sm:$0xff] %vm280_vm6, %v274_v12 }
 0x21b   : > { %283 = vadd.xlane.f32.xlu1 %v282_v14  ;;  %v277_v16 = vpop.f32.mrb[2].mxu0 }
 0x21c   : > { %v440_v17 = vpop.f32.mrb[3].mxu0  ;;  %v286_v18 = vsel %vm280_vm6, %v285_v15, 0.0 }
 0x21d   : > { %287 = vadd.xlane.f32.xlu0 %v286_v18 }
 0x21e   : > { %574 = shalt.err (!%p571_p10)
}
 0x21f   : > { %s575_s29 = scalar_lea.hbm %s820_s9, 128  ;;  %s579_s20 = scalar_lea.hbm %s866_s2, 256 }
 0x220   : > { %p576_p1 = scmp.ne.s32.totalorder %s820_s9, %s575_s29  ;;  %p580_p3 = scmp.lt.u32.totalorder %s820_s9, %s866_s2 }
 0x221   : > { %p581_p4 = scmp.lt.u32.totalorder %s579_s20, %s575_s29  ;;  %p583_p6 = scmp.lt.u32.totalorder %s575_s29, %s820_s9 }
 0x222   : > { %p577_p2 = pnand %p576_p1, %p753_p8 }
 0x223   : > { %p582_p11 = por %p581_p4, %p580_p3 }
 0x224   : > { %p578_p7 = pneg %p577_p2 }
 0x225   : > { %p584_p9 = por %p583_p6, %p582_p11 }
 0x227   : > { %p585_p12 = pnand %p584_p9, %p578_p7 }
 0x229   : > { %588 = shalt.err (!%p585_p12)
}
 0x22a   : > { %447 = dma.vmem_to_hbm [thread:$0]  (%p753_p8), %s311_s10, 128, %s820_s9, %s293_s21   ;;  %vm290_vm7 = vcmask 15360  }
 0x22b   : > { %p206_p13 = scmp.lt.s32.totalorder %s682_s16, 1 }
 0x22d   : > { %s893_s16 = smov (!%p206_p13, %s682_s16), 1 }
 0x22e   : > { %s427_s27 = sshll.u32 %s893_s16, 3 }
 0x22f   : > { %s209_s7 = scalar_lea.vmem %s867_s3, %s427_s27 }
 0x2a8   : > { %v284_v19 = vpop.xlane.xlu1 %283 }
 0x2aa   : > { %v288_v20 = vpop.xlane.xlu0 %287 }
 0x2ab   : > { %v289_v21 = vsel %vm216_vm1, %v284_v19, %v288_v20 }
 0x2ac   : > { %291 = vst.msk [vmem:[%s209_s7] sm:$0xff] %vm290_vm7, %v289_v21 }
 0x2ad PF: > { %s325_s17 = sand.u32 1, %s619_s12   ;;  %p886_p0 = scmp.ne.s32.totalorder %s872_s19, 0 }
 0x2ae   : > { %p887_p8 = scmp.ge.s32.totalorder %s631_s15, 2  ;;  %s326_s8 = scalar_lea.sflag [#allocation4], %s325_s17 }
 0x2b0   : > { %p458_p5 = pnand %p887_p8, %p886_p0 }
 0x2b2   : > { %614 = dma.done.wait (!%p458_p5), %s326_s8, 128  }
 0x2b3   : > { %616 = vsyncadd (!%p458_p5), %s326_s8, 4294967168  ;;  %p18_p10 = scmp.ge.s32.totalorder %s709_s23, 4   ;;  %s888_s12 = smov %s623_s13 }
 0x2b4   : > { %s889_s13 = smov %s627_s14  ;;  %s890_s14 = smov %s745_s11 }
 0x2b5   : > { %s891_s15 = smov %s709_s23  ;;  %20 = sbr.rel (!%p18_p10) target bundleno = 6 (0x6), region = 89 }
 0x2bc   :  { %338 = vsyncpa [#allocation3], 1 }
 0x2bd   :  { %340 = vsyncpa [#allocation3 + $0x1], 1 }
 0x2be   :  { %341 = vsyncpa [#allocation6], 1 }
 0x2bf   :  { %342 = vsyncpa [#allocation4], 1 }
 0x2c0   :  { %344 = vsyncpa [#allocation4 + $0x1], 1 }

</bundles_post_ra>
